<compile_context>
chip_gen: v6e
topology: v6e:2x2x1
jax: 0.10.0
libtpu: 0.0.40
codegen_flags: <defaults>
</compile_context>

<pallas_src>
import jax
import jax.numpy as jnp
from jax import lax
from jax.experimental import pallas as pl
from jax.experimental.pallas import tpu as pltpu

K = 5                # kernel_size
P = (K - 1) // 2     # padding = 2


def filter_high_kernel(x_ref, o_ref, pad_ref):
    # x_ref / o_ref: (H, W, Pb) block (planes on the lane axis).
    # pad_ref:       (H+2P, W+2P, Pb) zero-padded copy in the input dtype.
    H, W, Pb = x_ref.shape
    dt = pad_ref.dtype

    x = x_ref[...]                       # single load, reused twice below

    # count_include_pad=True -> zero padding around every (H, W) window.
    # Padding offsets live only on the outer (H) and sublane (W) axes; the
    # lane axis is never offset.  Borders are re-zeroed every step so the
    # kernel stays correct when the grid axis is split across TensorCores.
    pad_ref[:P, :, :] = jnp.zeros((P, W + 2 * P, Pb), dt)
    pad_ref[P + H:, :, :] = jnp.zeros((P, W + 2 * P, Pb), dt)
    pad_ref[P:P + H, :P, :] = jnp.zeros((H, P, Pb), dt)
    pad_ref[P:P + H, P + W:, :] = jnp.zeros((H, P, Pb), dt)
    pad_ref[P:P + H, P:P + W, :] = x

    # Separable 5x5 box sum, f32 accumulation.
    # 1) horizontal (W / sublane) 5-tap: shifted loads straight from the
    #    padded ref (4 adds / element).
    h = pad_ref[:, 0:W, :].astype(jnp.float32)
    for dx in range(1, K):
        h = h + pad_ref[:, dx:dx + W, :].astype(jnp.float32)
    # 2) vertical (H / outer-axis) 5-tap on the in-register value: slicing
    #    the leading axis of a value is just vreg selection — no scratch
    #    round-trip, no extra VMEM stores/loads (4 adds / element).
    box = h[0:H]
    for dy in range(1, K):
        box = box + h[dy:dy + H]

    low = box * (1.0 / (K * K))          # denominator is always K*K
    o_ref[...] = (0.5 + 0.5 * (x.astype(jnp.float32) - low)).astype(o_ref.dtype)


def _vmem_capacity_bytes():
    try:
        cap = int(getattr(pltpu.get_tpu_info(), "vmem_capacity_bytes", 0))
        if cap > 0:
            return cap
    except Exception:
        pass
    return 64 * 1024 * 1024  # conservative default (v7x per-core VMEM)


def _ceil_to(a, m):
    return -(-a // m) * m


def _padded_bytes(shape, dtype):
    """VMEM bytes for `shape` after (sublane, 128-lane) tile padding."""
    itemsize = jnp.dtype(dtype).itemsize
    sublane = {4: 8, 2: 16, 1: 32}.get(itemsize, 8)
    dims = list(shape)
    dims[-1] = _ceil_to(dims[-1], 128)
    if len(dims) >= 2:
        dims[-2] = _ceil_to(dims[-2], sublane)
    n = 1
    for d in dims:
        n *= d
    return n * itemsize


def _pick_block_planes(planes, H, W, dtype, budget_bytes, min_grid=2):
    """Pick the lane-axis block width Pb (a divisor of `planes`)."""
    def footprint(pb):
        io = 2 * 2 * _padded_bytes((H, W, pb), dtype)           # in+out, double-buffered
        pad = _padded_bytes((H + 2 * P, W + 2 * P, pb), dtype)  # padded scratch
        tmp = (_padded_bytes((H + 2 * P, W, pb), jnp.float32)   # horizontal-sum value
               + _padded_bytes((H, W, pb), jnp.float32))        # box / f32 temporaries
        return io + pad + tmp

    divisors = [d for d in range(1, planes + 1) if planes % d == 0]
    fitting = [d for d in divisors if footprint(d) <= budget_bytes]
    if not fitting:
        # TODO(synk): planes so large that even a single-plane block blows the
        # VMEM budget would need row-strip tiling with a 2-row halo.
        fitting = [1]

    def score(pb):
        grid_ok = (planes // pb) >= min_grid      # pipelining + v7x 2-TC split
        lane_dense = (pb % 128 == 0)              # full-width lanes / DMAs
        if planes < 128:                          # can never be lane-dense:
            return (grid_ok, pb)                  # prioritize grid length
        return (lane_dense, grid_ok, pb)

    return max(fitting, key=score)


def filter_high(img):
    """0.5 + 0.5*(img - AvgPool2d(img, 5, stride=1, pad=2, count_include_pad=True))."""
    N, C, H, W = img.shape
    planes = N * C

    cap = _vmem_capacity_bytes()
    pb = _pick_block_planes(planes, H, W, img.dtype, budget_bytes=int(cap * 0.45))
    g = planes // pb

    # Lane-dense layout: planes on the last (lane) axis, grid over the G axis.
    x = jnp.transpose(img.reshape(g, pb, H, W), (0, 2, 3, 1))   # (g, H, W, pb)

    out = pl.pallas_call(
        filter_high_kernel,
        out_shape=jax.ShapeDtypeStruct((g, H, W, pb), img.dtype),
        grid=(g,),
        in_specs=[pl.BlockSpec((None, H, W, pb), lambda i: (i, 0, 0, 0))],
        out_specs=pl.BlockSpec((None, H, W, pb), lambda i: (i, 0, 0, 0)),
        scratch_shapes=[pltpu.VMEM((H + 2 * P, W + 2 * P, pb), img.dtype)],
        compiler_params=pltpu.CompilerParams(
            dimension_semantics=("parallel",),
            vmem_limit_bytes=int(cap * 5 // 8)),
    )(x)

    return jnp.transpose(out, (0, 3, 1, 2)).reshape(N, C, H, W)


if __name__ == "__main__":
    key = jax.random.PRNGKey(0)
    # Small NCHW image batch (AvgPool path is channel-count agnostic).
    x = jax.random.uniform(key, (2, 4, 16, 16), dtype=jnp.float32)

    out = jax.block_until_ready(jax.jit(filter_high)(x))

    # Plain-JAX reference for the same semantics.
    padded = jnp.pad(x, ((0, 0), (0, 0), (P, P), (P, P)))
    low = lax.reduce_window(padded, 0.0, lax.add,
                            (1, 1, K, K), (1, 1, 1, 1), "VALID") / (K * K)
    ref = 0.5 + 0.5 * (x - low)
    assert jnp.allclose(out, ref, atol=1e-5), float(jnp.max(jnp.abs(out - ref)))

    print("KERNEL_OK")
</pallas_src>

<mosaic_0001>
module attributes {stable_mosaic.version = 11 : i64} {
  func.func @filter_high_kernel(%arg0: i32, %arg1: memref<1x16x16x4xf32, #tpu.memory_space<vmem>>, %arg2: memref<1x16x16x4xf32, #tpu.memory_space<vmem>>, %arg3: memref<20x20x4xf32, #tpu.memory_space<vmem>>) attributes {dimension_semantics = [#tpu.dimension_semantics<parallel>], iteration_bounds = array<i64: 2>, scalar_prefetch = 0 : i64, scratch_operands = 1 : i64, tpu.core_type = #tpu.core_type<tc>, window_params = [{transform_indices = @transform_0, window_bounds = array<i64: 1, 16, 16, 4>}, {transform_indices = @transform_1, window_bounds = array<i64: 1, 16, 16, 4>}]} {
    %c0 = arith.constant 0 : index
    %c0_0 = arith.constant 0 : index
    %c0_1 = arith.constant 0 : index
    %c0_2 = arith.constant 0 : index
    %0 = vector.load %arg1[%c0, %c0_0, %c0_1, %c0_2] : memref<1x16x16x4xf32, #tpu.memory_space<vmem>>, vector<1x16x16x4xf32>
    %1 = vector.shape_cast %0 : vector<1x16x16x4xf32> to vector<16x16x4xf32>
    %cst = arith.constant 0.000000e+00 : f32
    %2 = vector.broadcast %cst : f32 to vector<2x20x4xf32>
    %c0_3 = arith.constant 0 : index
    %c0_4 = arith.constant 0 : index
    %c0_5 = arith.constant 0 : index
    %3 = vector.load %arg3[%c0_3, %c0_4, %c0_5] : memref<20x20x4xf32, #tpu.memory_space<vmem>>, vector<2x20x4xf32>
    tpu.vector_store %arg3[%c0_3, %c0_4, %c0_5], %2 {strides = array<i32>} : memref<20x20x4xf32, #tpu.memory_space<vmem>>, vector<2x20x4xf32>,
    %cst_6 = arith.constant 0.000000e+00 : f32
    %4 = vector.broadcast %cst_6 : f32 to vector<2x20x4xf32>
    %c18 = arith.constant 18 : index
    %c0_7 = arith.constant 0 : index
    %c0_8 = arith.constant 0 : index
    %5 = vector.load %arg3[%c18, %c0_7, %c0_8] : memref<20x20x4xf32, #tpu.memory_space<vmem>>, vector<2x20x4xf32>
    tpu.vector_store %arg3[%c18, %c0_7, %c0_8], %4 {strides = array<i32>} : memref<20x20x4xf32, #tpu.memory_space<vmem>>, vector<2x20x4xf32>,
    %cst_9 = arith.constant 0.000000e+00 : f32
    %6 = vector.broadcast %cst_9 : f32 to vector<16x2x4xf32>
    %c2 = arith.constant 2 : index
    %c0_10 = arith.constant 0 : index
    %c0_11 = arith.constant 0 : index
    %7 = vector.load %arg3[%c2, %c0_10, %c0_11] : memref<20x20x4xf32, #tpu.memory_space<vmem>>, vector<16x2x4xf32>
    tpu.vector_store %arg3[%c2, %c0_10, %c0_11], %6 {strides = array<i32>} : memref<20x20x4xf32, #tpu.memory_space<vmem>>, vector<16x2x4xf32>,
    %cst_12 = arith.constant 0.000000e+00 : f32
    %8 = vector.broadcast %cst_12 : f32 to vector<16x2x4xf32>
    %c2_13 = arith.constant 2 : index
    %c18_14 = arith.constant 18 : index
    %c0_15 = arith.constant 0 : index
    %9 = vector.load %arg3[%c2_13, %c18_14, %c0_15] : memref<20x20x4xf32, #tpu.memory_space<vmem>>, vector<16x2x4xf32>
    tpu.vector_store %arg3[%c2_13, %c18_14, %c0_15], %8 {strides = array<i32>} : memref<20x20x4xf32, #tpu.memory_space<vmem>>, vector<16x2x4xf32>,
    %c2_16 = arith.constant 2 : index
    %c2_17 = arith.constant 2 : index
    %c0_18 = arith.constant 0 : index
    %10 = vector.load %arg3[%c2_16, %c2_17, %c0_18] : memref<20x20x4xf32, #tpu.memory_space<vmem>>, vector<16x16x4xf32>
    tpu.vector_store %arg3[%c2_16, %c2_17, %c0_18], %1 {strides = array<i32>} : memref<20x20x4xf32, #tpu.memory_space<vmem>>, vector<16x16x4xf32>,
    %c0_19 = arith.constant 0 : index
    %c0_20 = arith.constant 0 : index
    %c0_21 = arith.constant 0 : index
    %11 = vector.load %arg3[%c0_19, %c0_20, %c0_21] : memref<20x20x4xf32, #tpu.memory_space<vmem>>, vector<20x16x4xf32>
    %c0_22 = arith.constant 0 : index
    %c1 = arith.constant 1 : index
    %c0_23 = arith.constant 0 : index
    %12 = vector.load %arg3[%c0_22, %c1, %c0_23] : memref<20x20x4xf32, #tpu.memory_space<vmem>>, vector<20x16x4xf32>
    %13 = arith.addf %11, %12 : vector<20x16x4xf32>
    %c0_24 = arith.constant 0 : index
    %c2_25 = arith.constant 2 : index
    %c0_26 = arith.constant 0 : index
    %14 = vector.load %arg3[%c0_24, %c2_25, %c0_26] : memref<20x20x4xf32, #tpu.memory_space<vmem>>, vector<20x16x4xf32>
    %15 = arith.addf %13, %14 : vector<20x16x4xf32>
    %c0_27 = arith.constant 0 : index
    %c3 = arith.constant 3 : index
    %c0_28 = arith.constant 0 : index
    %16 = vector.load %arg3[%c0_27, %c3, %c0_28] : memref<20x20x4xf32, #tpu.memory_space<vmem>>, vector<20x16x4xf32>
    %17 = arith.addf %15, %16 : vector<20x16x4xf32>
    %c0_29 = arith.constant 0 : index
    %c4 = arith.constant 4 : index
    %c0_30 = arith.constant 0 : index
    %18 = vector.load %arg3[%c0_29, %c4, %c0_30] : memref<20x20x4xf32, #tpu.memory_space<vmem>>, vector<20x16x4xf32>
    %19 = arith.addf %17, %18 : vector<20x16x4xf32>
    %20 = vector.extract_strided_slice %19 {offsets = [0, 0, 0], sizes = [16, 16, 4], strides = [1, 1, 1]} : vector<20x16x4xf32> to vector<16x16x4xf32>
    %21 = vector.extract_strided_slice %19 {offsets = [1, 0, 0], sizes = [16, 16, 4], strides = [1, 1, 1]} : vector<20x16x4xf32> to vector<16x16x4xf32>
    %22 = arith.addf %20, %21 : vector<16x16x4xf32>
    %23 = vector.extract_strided_slice %19 {offsets = [2, 0, 0], sizes = [16, 16, 4], strides = [1, 1, 1]} : vector<20x16x4xf32> to vector<16x16x4xf32>
    %24 = arith.addf %22, %23 : vector<16x16x4xf32>
    %25 = vector.extract_strided_slice %19 {offsets = [3, 0, 0], sizes = [16, 16, 4], strides = [1, 1, 1]} : vector<20x16x4xf32> to vector<16x16x4xf32>
    %26 = arith.addf %24, %25 : vector<16x16x4xf32>
    %27 = vector.extract_strided_slice %19 {offsets = [4, 0, 0], sizes = [16, 16, 4], strides = [1, 1, 1]} : vector<20x16x4xf32> to vector<16x16x4xf32>
    %28 = arith.addf %26, %27 : vector<16x16x4xf32>
    %cst_31 = arith.constant 4.000000e-02 : f32
    %29 = vector.broadcast %cst_31 : f32 to vector<16x16x4xf32>
    %30 = arith.mulf %28, %29 : vector<16x16x4xf32>
    %31 = arith.subf %1, %30 : vector<16x16x4xf32>
    %cst_32 = arith.constant 5.000000e-01 : f32
    %32 = vector.broadcast %cst_32 : f32 to vector<16x16x4xf32>
    %33 = arith.mulf %32, %31 : vector<16x16x4xf32>
    %cst_33 = arith.constant 5.000000e-01 : f32
    %34 = vector.broadcast %cst_33 : f32 to vector<16x16x4xf32>
    %35 = arith.addf %34, %33 : vector<16x16x4xf32>
    %c0_34 = arith.constant 0 : index
    %c0_35 = arith.constant 0 : index
    %c0_36 = arith.constant 0 : index
    %c0_37 = arith.constant 0 : index
    %36 = vector.load %arg2[%c0_34, %c0_35, %c0_36, %c0_37] : memref<1x16x16x4xf32, #tpu.memory_space<vmem>>, vector<1x16x16x4xf32>
    %37 = vector.shape_cast %36 : vector<1x16x16x4xf32> to vector<16x16x4xf32>
    %38 = vector.shape_cast %35 : vector<16x16x4xf32> to vector<1x16x16x4xf32>
    tpu.vector_store %arg2[%c0_34, %c0_35, %c0_36, %c0_37], %38 {strides = array<i32>} : memref<1x16x16x4xf32, #tpu.memory_space<vmem>>, vector<1x16x16x4xf32>,
    return
  }
  func.func @transform_0(%arg0: i32) -> (i32, i32, i32, i32) {
    %c0_i32 = arith.constant 0 : i32
    %c0_i32_0 = arith.constant 0 : i32
    %c0_i32_1 = arith.constant 0 : i32
    %c0_i32_2 = arith.constant 0 : i32
    return %arg0, %c0_i32, %c0_i32_0, %c0_i32_1 : i32, i32, i32, i32
  }
  func.func @transform_1(%arg0: i32) -> (i32, i32, i32, i32) {
    %c0_i32 = arith.constant 0 : i32
    %c0_i32_0 = arith.constant 0 : i32
    %c0_i32_1 = arith.constant 0 : i32
    %c0_i32_2 = arith.constant 0 : i32
    return %arg0, %c0_i32, %c0_i32_0, %c0_i32_1 : i32, i32, i32, i32
  }
}

</mosaic_0001>

<bundles_post_ra>
// kernel: filter_high.1
= control target key start
LH: loop header
LB: loop body
LE: loop exit
PB: predicated region body
PF: predicated region fallthrough
CT: control target
= control target key end

     0   :  { %s974_s6 = smov 0   ;;  %s1494_s0 = inlined_call_operand.vmem [shape: f32[2,16,16,4], index: 0, kind: input, shape index: {}]   ;;  %s1495_s1 = inlined_call_operand.vmem [shape: f32[2,16,16,4], index: 1, kind: output, shape index: {}]  }
   0x1 LB: > { %s933_s7 = sadd.s32 4294967295, %s961_s6   ;;  %p937_p0 = scmp.ge.s32.totalorder %s961_s6, 1  ;;  %s961_s6 = sphi %s974_s6, %s11_s6  }
   0x2   : > { %p87_p1 = scmp.lt.s32.totalorder %s961_s6, 3 }
   0x4   : > { %p88_p2 = pnand %p937_p0, %p87_p1 }
   0x6   : > { %91 = sbr.rel (%p88_p2) target bundleno = 161 (0xa1), region = 24 }
   0xb   : > { %vm149_vm0 = vcmask 31744   ;;  %vm152_vm1 = vcmask 27648   ;;  %vm165_vm2 = vcmask 25600   ;;  %p984_p3 = scmp.lt.s32.totalorder %s933_s7, 1  ;;  %v963_v0 = vmov 0.0  }
   0xc   : > { %150 = vst.msk [vmem:[#allocation2] sm:$0xff] %vm149_vm0, %v963_v0  ;;  %151 = vst.msk [vmem:[#allocation2 + $0x8] sm:$0xff] %vm149_vm0, %v963_v0 }
   0xd   : > { %154 = vst.msk [vmem:[#allocation2 + $0x18] sm:$0xff] %vm149_vm0, %v963_v0  ;;  %155 = vst.msk [vmem:[#allocation2 + $0x20] sm:$0xff] %vm149_vm0, %v963_v0  ;;  %s1504_s7 = smov (!%p984_p3, %s933_s7), 1 }
   0xe   : > { %158 = vst.msk [vmem:[#allocation2 + $0x1b0] sm:$0xff] %vm149_vm0, %v963_v0  ;;  %159 = vst.msk [vmem:[#allocation2 + $0x1b8] sm:$0xff] %vm149_vm0, %v963_v0  ;;  %s944_s9 = sshll.u32 %s1504_s7, 8 }
   0xf   : > { %161 = vst.msk [vmem:[#allocation2 + $0x1c8] sm:$0xff] %vm149_vm0, %v963_v0  ;;  %162 = vst.msk [vmem:[#allocation2 + $0x1d0] sm:$0xff] %vm149_vm0, %v963_v0  ;;  %s1040_s12 = scalar_lea.vmem %s1494_s0, %s944_s9  ;;  %s1224_s15 = scalar_lea.vmem %s1495_s1, %s944_s9 }
  0x10   : > { %153 = vst.msk [vmem:[#allocation2 + $0x10] sm:$0xf] %vm152_vm1, %v963_v0  ;;  %156 = vst.msk [vmem:[#allocation2 + $0x28] sm:$0xf] %vm152_vm1, %v963_v0  ;;  %v1043_v1 = vld [vmem:[%s1040_s12] sm:$0xff]  ;;  %v1046_v2 = vld [vmem:[%s1040_s12 + $0x8] sm:$0xff] }
  0x11   : > { %160 = vst.msk [vmem:[#allocation2 + $0x1c0] sm:$0xf] %vm152_vm1, %v963_v0  ;;  %163 = vst.msk [vmem:[#allocation2 + $0x1d8] sm:$0xf] %vm152_vm1, %v963_v0  ;;  %v1049_v3 = vld [vmem:[%s1040_s12 + $0x10] sm:$0xff]  ;;  %v1058_v4 = vld [vmem:[%s1040_s12 + $0x18] sm:$0xff] }
  0x12   : > { %166 = vst.msk [vmem:[#allocation2 + $0x30] sm:$0x3] %vm165_vm2, %v963_v0  ;;  %167 = vst.msk [vmem:[#allocation2 + $0x48] sm:$0x3] %vm165_vm2, %v963_v0  ;;  %v1061_v5 = vld [vmem:[%s1040_s12 + $0x20] sm:$0xff]  ;;  %v1064_v6 = vld [vmem:[%s1040_s12 + $0x28] sm:$0xff] }
  0x13   : > { %168 = vst.msk [vmem:[#allocation2 + $0x60] sm:$0x3] %vm165_vm2, %v963_v0  ;;  %169 = vst.msk [vmem:[#allocation2 + $0x78] sm:$0x3] %vm165_vm2, %v963_v0  ;;  %v1073_v7 = vld [vmem:[%s1040_s12 + $0x30] sm:$0xff]  ;;  %v1076_v8 = vld [vmem:[%s1040_s12 + $0x38] sm:$0xff] }
  0x14   : > { %170 = vst.msk [vmem:[#allocation2 + $0x90] sm:$0x3] %vm165_vm2, %v963_v0  ;;  %171 = vst.msk [vmem:[#allocation2 + $0xa8] sm:$0x3] %vm165_vm2, %v963_v0  ;;  %v1079_v9 = vld [vmem:[%s1040_s12 + $0x40] sm:$0xff]  ;;  %v1088_v10 = vld [vmem:[%s1040_s12 + $0x48] sm:$0xff] }
  0x15   : > { %172 = vst.msk [vmem:[#allocation2 + $0xc0] sm:$0x3] %vm165_vm2, %v963_v0  ;;  %173 = vst.msk [vmem:[#allocation2 + $0xd8] sm:$0x3] %vm165_vm2, %v963_v0  ;;  %v1091_v11 = vld [vmem:[%s1040_s12 + $0x50] sm:$0xff]  ;;  %v1094_v12 = vld [vmem:[%s1040_s12 + $0x58] sm:$0xff] }
  0x16   : > { %174 = vst.msk [vmem:[#allocation2 + $0xf0] sm:$0x3] %vm165_vm2, %v963_v0  ;;  %175 = vst.msk [vmem:[#allocation2 + $0x108] sm:$0x3] %vm165_vm2, %v963_v0  ;;  %v1103_v13 = vld [vmem:[%s1040_s12 + $0x60] sm:$0xff]  ;;  %v1106_v14 = vld [vmem:[%s1040_s12 + $0x68] sm:$0xff] }
  0x17   : > { %176 = vst.msk [vmem:[#allocation2 + $0x120] sm:$0x3] %vm165_vm2, %v963_v0  ;;  %177 = vst.msk [vmem:[#allocation2 + $0x138] sm:$0x3] %vm165_vm2, %v963_v0  ;;  %v1109_v15 = vld [vmem:[%s1040_s12 + $0x70] sm:$0xff]  ;;  %v1118_v16 = vld [vmem:[%s1040_s12 + $0x78] sm:$0xff] }
  0x18   : > { %178 = vst.msk [vmem:[#allocation2 + $0x150] sm:$0x3] %vm165_vm2, %v963_v0  ;;  %179 = vst.msk [vmem:[#allocation2 + $0x168] sm:$0x3] %vm165_vm2, %v963_v0  ;;  %v1121_v17 = vld [vmem:[%s1040_s12 + $0x80] sm:$0xff]  ;;  %v1124_v18 = vld [vmem:[%s1040_s12 + $0x88] sm:$0xff] }
  0x19   : > { %180 = vst.msk [vmem:[#allocation2 + $0x180] sm:$0x3] %vm165_vm2, %v963_v0  ;;  %181 = vst.msk [vmem:[#allocation2 + $0x198] sm:$0x3] %vm165_vm2, %v963_v0  ;;  %v1133_v19 = vld [vmem:[%s1040_s12 + $0x90] sm:$0xff]  ;;  %v1136_v20 = vld [vmem:[%s1040_s12 + $0x98] sm:$0xff] }
  0x1a   : > { %182 = vst.msk [vmem:[#allocation2 + $0x42] sm:$0x3] %vm165_vm2, %v963_v0  ;;  %183 = vst.msk [vmem:[#allocation2 + $0x5a] sm:$0x3] %vm165_vm2, %v963_v0  ;;  %v1139_v21 = vld [vmem:[%s1040_s12 + $0xa0] sm:$0xff]  ;;  %v1148_v22 = vld [vmem:[%s1040_s12 + $0xa8] sm:$0xff] }
  0x1b   : > { %184 = vst.msk [vmem:[#allocation2 + $0x72] sm:$0x3] %vm165_vm2, %v963_v0  ;;  %185 = vst.msk [vmem:[#allocation2 + $0x8a] sm:$0x3] %vm165_vm2, %v963_v0  ;;  %v1151_v23 = vld [vmem:[%s1040_s12 + $0xb0] sm:$0xff]  ;;  %v1154_v24 = vld [vmem:[%s1040_s12 + $0xb8] sm:$0xff] }
  0x1c   : > { %186 = vst.msk [vmem:[#allocation2 + $0xa2] sm:$0x3] %vm165_vm2, %v963_v0  ;;  %187 = vst.msk [vmem:[#allocation2 + $0xba] sm:$0x3] %vm165_vm2, %v963_v0  ;;  %v1163_v25 = vld [vmem:[%s1040_s12 + $0xc0] sm:$0xff]  ;;  %v1166_v26 = vld [vmem:[%s1040_s12 + $0xc8] sm:$0xff] }
  0x1d   : > { %188 = vst.msk [vmem:[#allocation2 + $0xd2] sm:$0x3] %vm165_vm2, %v963_v0  ;;  %189 = vst.msk [vmem:[#allocation2 + $0xea] sm:$0x3] %vm165_vm2, %v963_v0  ;;  %v1169_v27 = vld [vmem:[%s1040_s12 + $0xd0] sm:$0xff]  ;;  %v1178_v28 = vld [vmem:[%s1040_s12 + $0xd8] sm:$0xff] }
  0x1e   : > { %190 = vst.msk [vmem:[#allocation2 + $0x102] sm:$0x3] %vm165_vm2, %v963_v0  ;;  %191 = vst.msk [vmem:[#allocation2 + $0x11a] sm:$0x3] %vm165_vm2, %v963_v0  ;;  %v1181_v29 = vld [vmem:[%s1040_s12 + $0xe0] sm:$0xff]  ;;  %v1184_v30 = vld [vmem:[%s1040_s12 + $0xe8] sm:$0xff] }
  0x1f   : > { %192 = vst.msk [vmem:[#allocation2 + $0x132] sm:$0x3] %vm165_vm2, %v963_v0  ;;  %193 = vst.msk [vmem:[#allocation2 + $0x14a] sm:$0x3] %vm165_vm2, %v963_v0  ;;  %v1193_v31 = vld [vmem:[%s1040_s12 + $0xf0] sm:$0xff]  ;;  %v1196_v32 = vld [vmem:[%s1040_s12 + $0xf8] sm:$0xff] }
  0x20   : > { %194 = vst.msk [vmem:[#allocation2 + $0x162] sm:$0x3] %vm165_vm2, %v963_v0  ;;  %195 = vst.msk [vmem:[#allocation2 + $0x17a] sm:$0x3] %vm165_vm2, %v963_v0  ;;  %v230_v33 = vld [vmem:[#allocation2] sm:$0xff]  ;;  %v232_v34 = vld [vmem:[#allocation2 + $0x18] sm:$0xff] }
  0x21   : > { %196 = vst.msk [vmem:[#allocation2 + $0x192] sm:$0x3] %vm165_vm2, %v963_v0  ;;  %197 = vst.msk [vmem:[#allocation2 + $0x1aa] sm:$0x3] %vm165_vm2, %v963_v0  ;;  %v270_v38 = vld [vmem:[#allocation2 + $0x1] sm:$0xff]  ;;  %v272_v39 = vld [vmem:[#allocation2 + $0x19] sm:$0xff] }
  0x22   : > { %198 = vst.msk [vmem:[#allocation2 + $0x32] sm:$0xff] %vm149_vm0, %v1043_v1  ;;  %199 = vst.msk [vmem:[#allocation2 + $0x3a] sm:$0xff] %vm149_vm0, %v1046_v2  ;;  %v310_v43 = vadd.f32 %v270_v38, %v230_v33  ;;  %v312_v44 = vadd.f32 %v272_v39, %v232_v34  ;;  %v350_v48 = vld [vmem:[#allocation2 + $0x2] sm:$0xff]  ;;  %v352_v49 = vld [vmem:[#allocation2 + $0x1a] sm:$0xff] }
  0x23   : > { %200 = vst.msk [vmem:[#allocation2 + $0x4a] sm:$0xff] %vm149_vm0, %v1049_v3  ;;  %201 = vst.msk [vmem:[#allocation2 + $0x52] sm:$0xff] %vm149_vm0, %v1058_v4  ;;  %v430_v55 = vld [vmem:[#allocation2 + $0x3] sm:$0xff]  ;;  %v432_v59 = vld [vmem:[#allocation2 + $0x1b] sm:$0xff] }
  0x24   : > { %202 = vst.msk [vmem:[#allocation2 + $0x62] sm:$0xff] %vm149_vm0, %v1061_v5  ;;  %203 = vst.msk [vmem:[#allocation2 + $0x6a] sm:$0xff] %vm149_vm0, %v1064_v6  ;;  %v390_v53 = vadd.f32 %v350_v48, %v310_v43  ;;  %v392_v54 = vadd.f32 %v352_v49, %v312_v44  ;;  %v510_v0 = vld [vmem:[#allocation2 + $0x4] sm:$0xff]  ;;  %v512_v33 = vld [vmem:[#allocation2 + $0x1c] sm:$0xff] }
  0x25   : > { %204 = vst.msk [vmem:[#allocation2 + $0x7a] sm:$0xff] %vm149_vm0, %v1073_v7  ;;  %205 = vst.msk [vmem:[#allocation2 + $0x82] sm:$0xff] %vm149_vm0, %v1076_v8  ;;  %v233_v43 = vld [vmem:[#allocation2 + $0x20] sm:$0xff] }
  0x26   : > { %206 = vst.msk [vmem:[#allocation2 + $0x92] sm:$0xff] %vm149_vm0, %v1079_v9  ;;  %207 = vst.msk [vmem:[#allocation2 + $0x9a] sm:$0xff] %vm149_vm0, %v1088_v10  ;;  %v470_v62 = vadd.f32 %v430_v55, %v390_v53  ;;  %v472_v63 = vadd.f32 %v432_v59, %v392_v54 }
  0x27   : > { %208 = vst.msk [vmem:[#allocation2 + $0xaa] sm:$0xff] %vm149_vm0, %v1091_v11  ;;  %209 = vst.msk [vmem:[#allocation2 + $0xb2] sm:$0xff] %vm149_vm0, %v1094_v12 }
  0x28   : > { %210 = vst.msk [vmem:[#allocation2 + $0xc2] sm:$0xff] %vm149_vm0, %v1103_v13  ;;  %211 = vst.msk [vmem:[#allocation2 + $0xca] sm:$0xff] %vm149_vm0, %v1106_v14 }
  0x29   : > { %212 = vst.msk [vmem:[#allocation2 + $0xda] sm:$0xff] %vm149_vm0, %v1109_v15  ;;  %213 = vst.msk [vmem:[#allocation2 + $0xe2] sm:$0xff] %vm149_vm0, %v1118_v16  ;;  %v234_v35 = vld [vmem:[#allocation2 + $0x30] sm:$0xff]  ;;  %v235_v44 = vld [vmem:[#allocation2 + $0x38] sm:$0xff] }
  0x2a   : > { %214 = vst.msk [vmem:[#allocation2 + $0xf2] sm:$0xff] %vm149_vm0, %v1121_v17  ;;  %215 = vst.msk [vmem:[#allocation2 + $0xfa] sm:$0xff] %vm149_vm0, %v1124_v18  ;;  %v236_v36 = vld [vmem:[#allocation2 + $0x48] sm:$0xff]  ;;  %v274_v40 = vld [vmem:[#allocation2 + $0x31] sm:$0xff] }
  0x2b   : > { %216 = vst.msk [vmem:[#allocation2 + $0x10a] sm:$0xff] %vm149_vm0, %v1133_v19  ;;  %217 = vst.msk [vmem:[#allocation2 + $0x112] sm:$0xff] %vm149_vm0, %v1136_v20  ;;  %v238_v37 = vld [vmem:[#allocation2 + $0x60] sm:$0xff]  ;;  %v276_v41 = vld [vmem:[#allocation2 + $0x49] sm:$0xff]  ;;  %v314_v45 = vadd.f32 %v274_v40, %v234_v35  ;;  %v550_v40 = vadd.f32 %v510_v0, %v470_v62 }
  0x2c   : > { %218 = vst.msk [vmem:[#allocation2 + $0x122] sm:$0xff] %vm149_vm0, %v1139_v21  ;;  %219 = vst.msk [vmem:[#allocation2 + $0x12a] sm:$0xff] %vm149_vm0, %v1148_v22  ;;  %v278_v42 = vld [vmem:[#allocation2 + $0x61] sm:$0xff]  ;;  %v316_v46 = vadd.f32 %v276_v41, %v236_v36  ;;  %v354_v50 = vld [vmem:[#allocation2 + $0x32] sm:$0xff]  ;;  %v552_v41 = vadd.f32 %v512_v33, %v472_v63 }
  0x2d   : > { %220 = vst.msk [vmem:[#allocation2 + $0x13a] sm:$0xff] %vm149_vm0, %v1151_v23  ;;  %221 = vst.msk [vmem:[#allocation2 + $0x142] sm:$0xff] %vm149_vm0, %v1154_v24  ;;  %v318_v47 = vadd.f32 %v278_v42, %v238_v37  ;;  %v356_v51 = vld [vmem:[#allocation2 + $0x4a] sm:$0xff]  ;;  %v358_v52 = vld [vmem:[#allocation2 + $0x62] sm:$0xff]  ;;  %v394_v56 = vadd.f32 %v354_v50, %v314_v45 }
  0x2e   : > { %222 = vst.msk [vmem:[#allocation2 + $0x152] sm:$0xff] %vm149_vm0, %v1163_v25  ;;  %223 = vst.msk [vmem:[#allocation2 + $0x15a] sm:$0xff] %vm149_vm0, %v1166_v26  ;;  %v396_v57 = vadd.f32 %v356_v51, %v316_v46  ;;  %v434_v60 = vld [vmem:[#allocation2 + $0x33] sm:$0xff]  ;;  %v436_v61 = vld [vmem:[#allocation2 + $0x4b] sm:$0xff]  ;;  %v590_v51 = vadd.f32 %v552_v41, %v550_v40 }
  0x2f   : > { %224 = vst.msk [vmem:[#allocation2 + $0x16a] sm:$0xff] %vm149_vm0, %v1169_v27  ;;  %225 = vst.msk [vmem:[#allocation2 + $0x172] sm:$0xff] %vm149_vm0, %v1178_v28  ;;  %v398_v58 = vadd.f32 %v358_v52, %v318_v47  ;;  %v438_v34 = vld [vmem:[#allocation2 + $0x63] sm:$0xff]  ;;  %v474_v35 = vadd.f32 %v434_v60, %v394_v56  ;;  %v514_v37 = vld [vmem:[#allocation2 + $0x34] sm:$0xff] }
  0x30   : > { %226 = vst.msk [vmem:[#allocation2 + $0x182] sm:$0xff] %vm149_vm0, %v1181_v29  ;;  %227 = vst.msk [vmem:[#allocation2 + $0x18a] sm:$0xff] %vm149_vm0, %v1184_v30  ;;  %v476_v36 = vadd.f32 %v436_v61, %v396_v57  ;;  %v516_v38 = vld [vmem:[#allocation2 + $0x4c] sm:$0xff]  ;;  %v518_v45 = vld [vmem:[#allocation2 + $0x64] sm:$0xff] }
  0x31   : > { %1499 = vst [vmem:[#allocation3_spill] sm:$0xff] %v1193_v31  ;;  %1500 = vst [vmem:[#allocation4_spill] sm:$0xff] %v1196_v32  ;;  %v478_v39 = vadd.f32 %v438_v34, %v398_v58  ;;  %v231_v42 = vld [vmem:[#allocation2 + $0x8] sm:$0xff]  ;;  %v554_v46 = vadd.f32 %v514_v37, %v474_v35  ;;  %v237_v48 = vld [vmem:[#allocation2 + $0x50] sm:$0xff] }
  0x32   : > { %228 = vst.msk [vmem:[#allocation2 + $0x19a] sm:$0xff] %vm149_vm0, %v1193_v31  ;;  %229 = vst.msk [vmem:[#allocation2 + $0x1a2] sm:$0xff] %vm149_vm0, %v1196_v32  ;;  %v1202_v47 = vadd.f32 %v516_v38, %v476_v36  ;;  %v239_v49 = vld [vmem:[#allocation2 + $0x68] sm:$0xff]  ;;  %v275_v53 = vld [vmem:[#allocation2 + $0x39] sm:$0xff] }
  0x33   : > { %v271_v50 = vld [vmem:[#allocation2 + $0x9] sm:$0xff]  ;;  %v273_v52 = vld [vmem:[#allocation2 + $0x21] sm:$0xff]  ;;  %v277_v54 = vld [vmem:[#allocation2 + $0x51] sm:$0xff]  ;;  %v315_v58 = vadd.f32 %v275_v53, %v235_v44  ;;  %v592_v62 = vadd.f32 %v554_v46, %v552_v41  ;;  %v1204_v63 = vadd.f32 %v518_v45, %v478_v39  ;;  %v622_v0 = vadd.f32 %v590_v51, %v554_v46 }
  0x34   : > { %v311_v55 = vadd.f32 %v271_v50, %v231_v42  ;;  %v279_v56 = vld [vmem:[#allocation2 + $0x69] sm:$0xff]  ;;  %v313_v57 = vadd.f32 %v273_v52, %v233_v43  ;;  %v317_v59 = vadd.f32 %v277_v54, %v237_v48  ;;  %v355_v34 = vld [vmem:[#allocation2 + $0x3a] sm:$0xff]  ;;  %v357_v35 = vld [vmem:[#allocation2 + $0x52] sm:$0xff]  ;;  %v594_v43 = vadd.f32 %v1202_v47, %v554_v46 }
  0x35   : > { %v351_v60 = vld [vmem:[#allocation2 + $0xa] sm:$0xff]  ;;  %v353_v61 = vld [vmem:[#allocation2 + $0x22] sm:$0xff]  ;;  %v319_v33 = vadd.f32 %v279_v56, %v239_v49  ;;  %v395_v40 = vadd.f32 %v355_v34, %v315_v58  ;;  %v654_v44 = vadd.f32 %v622_v0, %v1202_v47  ;;  %v437_v41 = vld [vmem:[#allocation2 + $0x53] sm:$0xff]  ;;  %v624_v49 = vadd.f32 %v592_v62, %v1202_v47 }
  0x36   : > { %v391_v36 = vadd.f32 %v351_v60, %v311_v55  ;;  %v359_v37 = vld [vmem:[#allocation2 + $0x6a] sm:$0xff]  ;;  %v393_v38 = vadd.f32 %v353_v61, %v313_v57  ;;  %v397_v32 = vadd.f32 %v357_v35, %v317_v59  ;;  %v435_v50 = vld [vmem:[#allocation2 + $0x3b] sm:$0xff] }
  0x37   : > { %v431_v31 = vld [vmem:[#allocation2 + $0xb] sm:$0xff]  ;;  %v433_v42 = vld [vmem:[#allocation2 + $0x23] sm:$0xff]  ;;  %v399_v48 = vadd.f32 %v359_v37, %v319_v33  ;;  %v475_v53 = vadd.f32 %v435_v50, %v395_v40  ;;  %v686_v57 = vadd.f32 %v654_v44, %v1204_v63  ;;  %v517_v59 = vld [vmem:[#allocation2 + $0x54] sm:$0xff] }
  0x38   : > { %v471_v39 = vadd.f32 %v431_v31, %v391_v36  ;;  %v511_v45 = vld [vmem:[#allocation2 + $0xc] sm:$0xff]  ;;  %v473_v52 = vadd.f32 %v433_v42, %v393_v38  ;;  %v477_v54 = vadd.f32 %v437_v41, %v397_v32  ;;  %v513_v55 = vld [vmem:[#allocation2 + $0x24] sm:$0xff]  ;;  %v515_v56 = vld [vmem:[#allocation2 + $0x3c] sm:$0xff]  ;;  %v656_v32 = vadd.f32 %v624_v49, %v1204_v63 }
  0x39   : > { %v439_v51 = vld [vmem:[#allocation2 + $0x6b] sm:$0xff]  ;;  %v240_v60 = vld [vmem:[#allocation2 + $0x78] sm:$0xff]  ;;  %v555_v34 = vadd.f32 %v515_v56, %v475_v53  ;;  %v718_v36 = vmul.f32 0.04, %v686_v57  ;;  %v241_v38 = vld [vmem:[#allocation2 + $0x80] sm:$0xff]  ;;  %v626_v42 = vadd.f32 %v594_v43, %v1204_v63 }
  0x3a   : > { %v479_v58 = vadd.f32 %v439_v51, %v399_v48  ;;  %v551_v46 = vadd.f32 %v511_v45, %v471_v39  ;;  %v280_v61 = vld [vmem:[#allocation2 + $0x79] sm:$0xff]  ;;  %v519_v0 = vld [vmem:[#allocation2 + $0x6c] sm:$0xff]  ;;  %v553_v33 = vadd.f32 %v513_v55, %v473_v52  ;;  %v557_v31 = vadd.f32 %v517_v59, %v477_v54  ;;  %v281_v40 = vld [vmem:[#allocation2 + $0x81] sm:$0xff] }
  0x3b   : > { %v320_v35 = vadd.f32 %v280_v61, %v240_v60  ;;  %v360_v37 = vld [vmem:[#allocation2 + $0x7a] sm:$0xff]  ;;  %v321_v50 = vadd.f32 %v281_v40, %v241_v38  ;;  %v242_v39 = vld [vmem:[#allocation2 + $0x90] sm:$0xff]  ;;  %v750_v45 = vsub.f32 %v1043_v1, %v718_v36  ;;  %v361_v52 = vld [vmem:[#allocation2 + $0x82] sm:$0xff]  ;;  %v596_v55 = vadd.f32 %v1204_v63, %v1202_v47 }
  0x3c   : > { %v1210_v62 = vadd.f32 %v519_v0, %v479_v58  ;;  %v591_v44 = vadd.f32 %v553_v33, %v551_v46  ;;  %v593_v41 = vadd.f32 %v555_v34, %v553_v33  ;;  %v440_v51 = vld [vmem:[#allocation2 + $0x7b] sm:$0xff]  ;;  %v282_v53 = vld [vmem:[#allocation2 + $0x91] sm:$0xff]  ;;  %v595_v54 = vadd.f32 %v557_v31, %v555_v34  ;;  %v441_v0 = vld [vmem:[#allocation2 + $0x83] sm:$0xff] }
  0x3d   : > { %v400_v48 = vadd.f32 %v360_v37, %v320_v35  ;;  %v401_v43 = vadd.f32 %v361_v52, %v321_v50  ;;  %v243_v59 = vld [vmem:[#allocation2 + $0x98] sm:$0xff]  ;;  %v782_v60 = vmul.f32 0.5, %v750_v45  ;;  %v322_v1 = vadd.f32 %v282_v53, %v242_v39 }
  0x3e   : > { %v597_v49 = vadd.f32 %v1210_v62, %v557_v31  ;;  %v623_v56 = vadd.f32 %v591_v44, %v555_v34  ;;  %v625_v58 = vadd.f32 %v593_v41, %v557_v31  ;;  %v283_v46 = vld [vmem:[#allocation2 + $0x99] sm:$0xff]  ;;  %v627_v36 = vadd.f32 %v595_v54, %v1210_v62  ;;  %v244_v44 = vld [vmem:[#allocation2 + $0xa8] sm:$0xff] }
  0x3f   : > { %v480_v57 = vadd.f32 %v440_v51, %v400_v48  ;;  %v520_v61 = vld [vmem:[#allocation2 + $0x7c] sm:$0xff]  ;;  %v362_v33 = vld [vmem:[#allocation2 + $0x92] sm:$0xff]  ;;  %v323_v35 = vadd.f32 %v283_v46, %v243_v59  ;;  %v481_v37 = vadd.f32 %v441_v0, %v401_v43  ;;  %v284_v48 = vld [vmem:[#allocation2 + $0xa9] sm:$0xff]  ;;  %v814_v50 = vadd.f32 0.5, %v782_v60 }
  0x40   : > { %v655_v47 = vadd.f32 %v623_v56, %v557_v31  ;;  %v657_v38 = vadd.f32 %v625_v58, %v1210_v62  ;;  %v363_v40 = vld [vmem:[#allocation2 + $0x9a] sm:$0xff]  ;;  %v521_v41 = vld [vmem:[#allocation2 + $0x84] sm:$0xff]  ;;  %v402_v39 = vadd.f32 %v362_v33, %v322_v1  ;;  %v324_v53 = vadd.f32 %v284_v48, %v244_v44  ;;  %v245_v58 = vld [vmem:[#allocation2 + $0xb0] sm:$0xff] }
  0x41   : > { %v1226_v34 = vadd.f32 %v520_v61, %v480_v57  ;;  %v442_v45 = vld [vmem:[#allocation2 + $0x93] sm:$0xff]  ;;  %v403_v51 = vadd.f32 %v363_v40, %v323_v35  ;;  %v443_v52 = vld [vmem:[#allocation2 + $0x9b] sm:$0xff]  ;;  %v1231_v56 = vadd.f32 %v521_v41, %v481_v37  ;;  %v364_v43 = vld [vmem:[#allocation2 + $0xaa] sm:$0xff]  ;;  %846 = vst.msk [vmem:[%s1224_s15] sm:$0xff] %vm149_vm0, %v814_v50 }
  0x42   : > { %v687_v54 = vadd.f32 %v655_v47, %v1210_v62  ;;  %v285_v59 = vld [vmem:[#allocation2 + $0xb1] sm:$0xff]  ;;  %v482_v46 = vadd.f32 %v442_v45, %v402_v39  ;;  %v404_v0 = vadd.f32 %v364_v43, %v324_v53 }
  0x43   : > { %v688_v31 = vadd.f32 %v656_v32, %v1226_v34  ;;  %v658_v57 = vadd.f32 %v626_v42, %v1226_v34  ;;  %v522_v60 = vld [vmem:[#allocation2 + $0x94] sm:$0xff]  ;;  %v483_v61 = vadd.f32 %v443_v52, %v403_v51  ;;  %v628_v1 = vadd.f32 %v596_v55, %v1226_v34  ;;  %v523_v32 = vld [vmem:[#allocation2 + $0x9c] sm:$0xff]  ;;  %v444_v40 = vld [vmem:[#allocation2 + $0xab] sm:$0xff] }
  0x44   : > { %v719_v33 = vmul.f32 0.04, %v687_v54  ;;  %v689_v47 = vadd.f32 %v657_v38, %v1231_v56  ;;  %v659_v37 = vadd.f32 %v627_v36, %v1231_v56  ;;  %v1239_v42 = vadd.f32 %v522_v60, %v482_v46  ;;  %v524_v55 = vld [vmem:[#allocation2 + $0xac] sm:$0xff]  ;;  %v286_v46 = vld [vmem:[#allocation2 + $0xc1] sm:$0xff] }
  0x45   : > { %v720_v35 = vmul.f32 0.04, %v688_v31  ;;  %v1241_v44 = vadd.f32 %v523_v32, %v483_v61  ;;  %v484_v48 = vadd.f32 %v444_v40, %v404_v0  ;;  %v325_v50 = vadd.f32 %v285_v59, %v245_v58  ;;  %v365_v54 = vld [vmem:[#allocation2 + $0xb2] sm:$0xff]  ;;  %v247_v0 = vld [vmem:[#allocation2 + $0xc8] sm:$0xff] }
  0x46   : > { %v751_v41 = vsub.f32 %v1046_v2, %v719_v33  ;;  %v721_v45 = vmul.f32 0.04, %v689_v47  ;;  %v629_v51 = vadd.f32 %v597_v49, %v1231_v56  ;;  %v690_v38 = vadd.f32 %v658_v57, %v1239_v42  ;;  %v445_v59 = vld [vmem:[#allocation2 + $0xb3] sm:$0xff]  ;;  %v287_v33 = vld [vmem:[#allocation2 + $0xc9] sm:$0xff] }
  0x47   : > { %v752_v39 = vsub.f32 %v1049_v3, %v720_v35  ;;  %v691_v52 = vadd.f32 %v659_v37, %v1241_v44  ;;  %v1248_v36 = vadd.f32 %v524_v55, %v484_v48  ;;  %v660_v53 = vadd.f32 %v628_v1, %v1239_v42  ;;  %v246_v3 = vld [vmem:[#allocation2 + $0xc0] sm:$0xff]  ;;  %v525_v48 = vld [vmem:[#allocation2 + $0xb4] sm:$0xff] }
  0x48   : > { %v783_v31 = vmul.f32 0.5, %v751_v41  ;;  %v753_v58 = vsub.f32 %v1058_v4, %v721_v45  ;;  %v405_v2 = vadd.f32 %v365_v54, %v325_v50  ;;  %v722_v60 = vmul.f32 0.04, %v690_v38  ;;  %v366_v45 = vld [vmem:[#allocation2 + $0xc2] sm:$0xff] }
  0x49   : > { %v784_v43 = vmul.f32 0.5, %v752_v39  ;;  %v723_v49 = vmul.f32 0.04, %v691_v52  ;;  %v692_v57 = vadd.f32 %v660_v53, %v1248_v36  ;;  %v661_v61 = vadd.f32 %v629_v51, %v1241_v44  ;;  %v367_v53 = vld [vmem:[#allocation2 + $0xca] sm:$0xff] }
  0x4a   : > { %v815_v1 = vadd.f32 0.5, %v783_v31  ;;  %v785_v47 = vmul.f32 0.5, %v753_v58  ;;  %v485_v32 = vadd.f32 %v445_v59, %v405_v2  ;;  %v754_v4 = vsub.f32 %v1061_v5, %v722_v60  ;;  %v446_v31 = vld [vmem:[#allocation2 + $0xc3] sm:$0xff]  ;;  %v288_v59 = vld [vmem:[#allocation2 + $0xd9] sm:$0xff] }
  0x4b   : > { %v816_v35 = vadd.f32 0.5, %v784_v43  ;;  %v755_v37 = vsub.f32 %v1064_v6, %v723_v49  ;;  %v724_v40 = vmul.f32 0.04, %v692_v57  ;;  %v326_v50 = vadd.f32 %v286_v46, %v246_v3  ;;  %v447_v49 = vld [vmem:[#allocation2 + $0xcb] sm:$0xff]  ;;  %v249_v57 = vld [vmem:[#allocation2 + $0xe0] sm:$0xff] }
  0x4c   : > { %847 = vst.msk [vmem:[%s1224_s15 + $0x8] sm:$0xff] %vm149_vm0, %v815_v1  ;;  %v817_v41 = vadd.f32 0.5, %v785_v47  ;;  %v1260_v39 = vadd.f32 %v525_v48, %v485_v32  ;;  %v598_v55 = vadd.f32 %v1226_v34, %v1204_v63  ;;  %v327_v51 = vadd.f32 %v287_v33, %v247_v0  ;;  %v248_v63 = vld [vmem:[#allocation2 + $0xd8] sm:$0xff]  ;;  %v289_v0 = vld [vmem:[#allocation2 + $0xe1] sm:$0xff]  ;;  %v250_v48 = vld [vmem:[#allocation2 + $0xf0] sm:$0xff] }
  0x4d   : > { %848 = vst.msk [vmem:[%s1224_s15 + $0x10] sm:$0xff] %vm149_vm0, %v816_v35  ;;  %v786_v38 = vmul.f32 0.5, %v754_v4  ;;  %v787_v5 = vmul.f32 0.5, %v755_v37  ;;  %v756_v6 = vsub.f32 %v1073_v7, %v724_v40  ;;  %v406_v52 = vadd.f32 %v366_v45, %v326_v50  ;;  %v527_v4 = vld [vmem:[#allocation2 + $0xcc] sm:$0xff] }
  0x4e   : > { %849 = vst.msk [vmem:[%s1224_s15 + $0x18] sm:$0xff] %vm149_vm0, %v817_v41  ;;  %v693_v54 = vadd.f32 %v661_v61, %v1260_v39  ;;  %v630_v43 = vadd.f32 %v598_v55, %v1239_v42  ;;  %v407_v58 = vadd.f32 %v367_v53, %v327_v51  ;;  %v599_v2 = vadd.f32 %v1231_v56, %v1210_v62  ;;  %v526_v61 = vld [vmem:[#allocation2 + $0xc4] sm:$0xff]  ;;  %v290_v50 = vld [vmem:[#allocation2 + $0xf1] sm:$0xff]  ;;  %v368_v51 = vld [vmem:[#allocation2 + $0xda] sm:$0xff] }
  0x4f   : > { %v818_v3 = vadd.f32 0.5, %v786_v38  ;;  %v819_v46 = vadd.f32 0.5, %v787_v5  ;;  %v788_v7 = vmul.f32 0.5, %v756_v6  ;;  %v486_v60 = vadd.f32 %v446_v31, %v406_v52  ;;  %v369_v53 = vld [vmem:[#allocation2 + $0xe2] sm:$0xff] }
  0x50   : > { %v725_v33 = vmul.f32 0.04, %v693_v54  ;;  %v662_v1 = vadd.f32 %v630_v43, %v1248_v36  ;;  %v487_v35 = vadd.f32 %v447_v49, %v407_v58  ;;  %v631_v47 = vadd.f32 %v599_v2, %v1241_v44  ;;  %v448_v31 = vld [vmem:[#allocation2 + $0xdb] sm:$0xff]  ;;  %v449_v58 = vld [vmem:[#allocation2 + $0xe3] sm:$0xff] }
  0x51   : > { %850 = vst.msk [vmem:[%s1224_s15 + $0x20] sm:$0xff] %vm149_vm0, %v818_v3  ;;  %851 = vst.msk [vmem:[%s1224_s15 + $0x28] sm:$0xff] %vm149_vm0, %v819_v46  ;;  %v820_v62 = vadd.f32 0.5, %v788_v7  ;;  %v1277_v32 = vadd.f32 %v526_v61, %v486_v60  ;;  %v328_v37 = vadd.f32 %v288_v59, %v248_v63  ;;  %v600_v40 = vadd.f32 %v1239_v42, %v1226_v34  ;;  %v370_v7 = vld [vmem:[#allocation2 + $0xf2] sm:$0xff] }
  0x52   : > { %v757_v41 = vsub.f32 %v1076_v8, %v725_v33  ;;  %v1282_v45 = vadd.f32 %v527_v4, %v487_v35  ;;  %v663_v55 = vadd.f32 %v631_v47, %v1260_v39  ;;  %v329_v38 = vadd.f32 %v289_v0, %v249_v57  ;;  %v251_v60 = vld [vmem:[#allocation2 + $0xf8] sm:$0xff]  ;;  %v529_v47 = vld [vmem:[#allocation2 + $0xe4] sm:$0xff] }
  0x53   : > { %852 = vst.msk [vmem:[%s1224_s15 + $0x30] sm:$0xff] %vm149_vm0, %v820_v62  ;;  %v694_v5 = vadd.f32 %v662_v1, %v1277_v32  ;;  %v408_v6 = vadd.f32 %v368_v51, %v328_v37  ;;  %v632_v52 = vadd.f32 %v600_v40, %v1248_v36  ;;  %v601_v34 = vadd.f32 %v1241_v44, %v1231_v56  ;;  %v291_v49 = vld [vmem:[#allocation2 + $0xf9] sm:$0xff] }
  0x54   : > { %v789_v54 = vmul.f32 0.5, %v757_v41  ;;  %v695_v8 = vadd.f32 %v663_v55, %v1282_v45  ;;  %v409_v43 = vadd.f32 %v369_v53, %v329_v38  ;;  %v330_v2 = vadd.f32 %v290_v50, %v250_v48  ;;  %v528_v56 = vld [vmem:[#allocation2 + $0xdc] sm:$0xff]  ;;  %v450_v4 = vld [vmem:[#allocation2 + $0xf3] sm:$0xff] }
  0x55   : > { %v726_v63 = vmul.f32 0.04, %v694_v5  ;;  %v488_v59 = vadd.f32 %v448_v31, %v408_v6  ;;  %v664_v3 = vadd.f32 %v632_v52, %v1277_v32  ;;  %v633_v46 = vadd.f32 %v601_v34, %v1260_v39  ;;  %v530_v41 = vld [vmem:[#allocation2 + $0xf4] sm:$0xff]  ;;  %v252_v52 = vld [vmem:[#allocation2 + $0x108] sm:$0xff] }
  0x56   : > { %v821_v57 = vadd.f32 0.5, %v789_v54  ;;  %v727_v0 = vmul.f32 0.04, %v695_v8  ;;  %v489_v33 = vadd.f32 %v449_v58, %v409_v43  ;;  %v410_v61 = vadd.f32 %v370_v7, %v330_v2  ;;  %v371_v5 = vld [vmem:[#allocation2 + $0xfa] sm:$0xff] }
  0x57   : > { %v758_v1 = vsub.f32 %v1079_v9, %v726_v63  ;;  %v1295_v35 = vadd.f32 %v528_v56, %v488_v59  ;;  %v665_v62 = vadd.f32 %v633_v46, %v1282_v45  ;;  %v602_v37 = vadd.f32 %v1248_v36, %v1239_v42  ;;  %v292_v42 = vld [vmem:[#allocation2 + $0x109] sm:$0xff]  ;;  %v451_v58 = vld [vmem:[#allocation2 + $0xfb] sm:$0xff]  ;;  %v293_v59 = vld [vmem:[#allocation2 + $0x111] sm:$0xff] }
  0x58   : > { %853 = vst.msk [vmem:[%s1224_s15 + $0x38] sm:$0xff] %vm149_vm0, %v821_v57  ;;  %v759_v40 = vsub.f32 %v1088_v10, %v727_v0  ;;  %v1303_v48 = vadd.f32 %v529_v47, %v489_v33  ;;  %v490_v50 = vadd.f32 %v450_v4, %v410_v61  ;;  %v331_v55 = vadd.f32 %v291_v49, %v251_v60  ;;  %v253_v63 = vld [vmem:[#allocation2 + $0x110] sm:$0xff]  ;;  %v531_v57 = vld [vmem:[#allocation2 + $0xfc] sm:$0xff] }
  0x59   : > { %v790_v51 = vmul.f32 0.5, %v758_v1  ;;  %v696_v9 = vadd.f32 %v664_v3, %v1295_v35  ;;  %v634_v38 = vadd.f32 %v602_v37, %v1277_v32  ;;  %v603_v6 = vadd.f32 %v1260_v39, %v1241_v44  ;;  %v372_v56 = vld [vmem:[#allocation2 + $0x10a] sm:$0xff] }
  0x5a   : > { %v791_v53 = vmul.f32 0.5, %v759_v40  ;;  %v697_v10 = vadd.f32 %v665_v62, %v1303_v48  ;;  %v1310_v34 = vadd.f32 %v530_v41, %v490_v50  ;;  %v411_v54 = vadd.f32 %v371_v5, %v331_v55  ;;  %v373_v50 = vld [vmem:[#allocation2 + $0x112] sm:$0xff]  ;;  %v294_v5 = vld [vmem:[#allocation2 + $0x121] sm:$0xff] }
  0x5b   : > { %v822_v8 = vadd.f32 0.5, %v790_v51  ;;  %v728_v31 = vmul.f32 0.04, %v696_v9  ;;  %v666_v43 = vadd.f32 %v634_v38, %v1295_v35  ;;  %v635_v2 = vadd.f32 %v603_v6, %v1282_v45  ;;  %v532_v9 = vld [vmem:[#allocation2 + $0x10c] sm:$0xff]  ;;  %v254_v38 = vld [vmem:[#allocation2 + $0x120] sm:$0xff] }
  0x5c   : > { %v823_v44 = vadd.f32 0.5, %v791_v53  ;;  %v729_v3 = vmul.f32 0.04, %v697_v10  ;;  %v491_v46 = vadd.f32 %v451_v58, %v411_v54  ;;  %v332_v7 = vadd.f32 %v292_v42, %v252_v52  ;;  %v453_v53 = vld [vmem:[#allocation2 + $0x113] sm:$0xff]  ;;  %v255_v54 = vld [vmem:[#allocation2 + $0x128] sm:$0xff] }
  0x5d   : > { %854 = vst.msk [vmem:[%s1224_s15 + $0x40] sm:$0xff] %vm149_vm0, %v822_v8  ;;  %v760_v60 = vsub.f32 %v1091_v11, %v728_v31  ;;  %v698_v49 = vadd.f32 %v666_v43, %v1310_v34  ;;  %v667_v0 = vadd.f32 %v635_v2, %v1303_v48  ;;  %v604_v33 = vadd.f32 %v1277_v32, %v1248_v36  ;;  %v452_v11 = vld [vmem:[#allocation2 + $0x10b] sm:$0xff] }
  0x5e   : > { %855 = vst.msk [vmem:[%s1224_s15 + $0x48] sm:$0xff] %vm149_vm0, %v823_v44  ;;  %v761_v61 = vsub.f32 %v1094_v12, %v729_v3  ;;  %v1324_v1 = vadd.f32 %v531_v57, %v491_v46  ;;  %v412_v47 = vadd.f32 %v372_v56, %v332_v7  ;;  %v333_v62 = vadd.f32 %v293_v59, %v253_v63  ;;  %v533_v63 = vld [vmem:[#allocation2 + $0x114] sm:$0xff] }
  0x5f   : > { %v792_v4 = vmul.f32 0.5, %v760_v60  ;;  %v730_v37 = vmul.f32 0.04, %v698_v49  ;;  %v636_v40 = vadd.f32 %v604_v33, %v1295_v35  ;;  %v605_v41 = vadd.f32 %v1282_v45, %v1260_v39  ;;  %v295_v39 = vld [vmem:[#allocation2 + $0x129] sm:$0xff]  ;;  %v256_v57 = vld [vmem:[#allocation2 + $0x138] sm:$0xff] }
  0x60   : > { %v793_v55 = vmul.f32 0.5, %v761_v61  ;;  %v699_v36 = vadd.f32 %v667_v0, %v1324_v1  ;;  %v492_v51 = vadd.f32 %v452_v11, %v412_v47  ;;  %v413_v12 = vadd.f32 %v373_v50, %v333_v62  ;;  %v374_v60 = vld [vmem:[#allocation2 + $0x122] sm:$0xff]  ;;  %v296_v0 = vld [vmem:[#allocation2 + $0x139] sm:$0xff]  ;;  %v375_v47 = vld [vmem:[#allocation2 + $0x12a] sm:$0xff] }
  0x61   : > { %v824_v6 = vadd.f32 0.5, %v792_v4  ;;  %v762_v52 = vsub.f32 %v1103_v13, %v730_v37  ;;  %v668_v42 = vadd.f32 %v636_v40, %v1310_v34  ;;  %v637_v10 = vadd.f32 %v605_v41, %v1303_v48  ;;  %v454_v37 = vld [vmem:[#allocation2 + $0x123] sm:$0xff]  ;;  %v455_v41 = vld [vmem:[#allocation2 + $0x12b] sm:$0xff] }
  0x62   : > { %v825_v8 = vadd.f32 0.5, %v793_v55  ;;  %v731_v31 = vmul.f32 0.04, %v699_v36  ;;  %v1333_v43 = vadd.f32 %v532_v9, %v492_v51  ;;  %v493_v58 = vadd.f32 %v453_v53, %v413_v12  ;;  %v257_v51 = vld [vmem:[#allocation2 + $0x140] sm:$0xff]  ;;  %v535_v53 = vld [vmem:[#allocation2 + $0x12c] sm:$0xff] }
  0x63   : > { %856 = vst.msk [vmem:[%s1224_s15 + $0x50] sm:$0xff] %vm149_vm0, %v824_v6  ;;  %v794_v2 = vmul.f32 0.5, %v762_v52  ;;  %v669_v59 = vadd.f32 %v637_v10, %v1324_v1  ;;  %v334_v13 = vadd.f32 %v294_v5, %v254_v38  ;;  %v606_v44 = vadd.f32 %v1295_v35, %v1277_v32  ;;  %v297_v9 = vld [vmem:[#allocation2 + $0x141] sm:$0xff] }
  0x64   : > { %857 = vst.msk [vmem:[%s1224_s15 + $0x58] sm:$0xff] %vm149_vm0, %v825_v8  ;;  %v763_v3 = vsub.f32 %v1106_v14, %v731_v31  ;;  %v700_v46 = vadd.f32 %v668_v42, %v1333_v43  ;;  %v1344_v7 = vadd.f32 %v533_v63, %v493_v58  ;;  %v335_v49 = vadd.f32 %v295_v39, %v255_v54  ;;  %v534_v5 = vld [vmem:[#allocation2 + $0x124] sm:$0xff]  ;;  %v376_v52 = vld [vmem:[#allocation2 + $0x13a] sm:$0xff] }
  0x65   : > { %v826_v56 = vadd.f32 0.5, %v794_v2  ;;  %v414_v33 = vadd.f32 %v374_v60, %v334_v13  ;;  %v638_v61 = vadd.f32 %v606_v44, %v1310_v34  ;;  %v607_v32 = vadd.f32 %v1303_v48, %v1282_v45  ;;  %v377_v44 = vld [vmem:[#allocation2 + $0x142] sm:$0xff] }
  0x66   : > { %v795_v62 = vmul.f32 0.5, %v763_v3  ;;  %v732_v4 = vmul.f32 0.04, %v700_v46  ;;  %v701_v14 = vadd.f32 %v669_v59, %v1344_v7  ;;  %v415_v11 = vadd.f32 %v375_v47, %v335_v49  ;;  %v298_v46 = vld [vmem:[#allocation2 + $0x151] sm:$0xff]  ;;  %v457_v47 = vld [vmem:[#allocation2 + $0x143] sm:$0xff] }
  0x67   : > { %858 = vst.msk [vmem:[%s1224_s15 + $0x60] sm:$0xff] %vm149_vm0, %v826_v56  ;;  %v494_v40 = vadd.f32 %v454_v37, %v414_v33  ;;  %v670_v50 = vadd.f32 %v638_v61, %v1333_v43  ;;  %v639_v55 = vadd.f32 %v607_v32, %v1324_v1  ;;  %v336_v36 = vadd.f32 %v296_v0, %v256_v57  ;;  %v536_v57 = vld [vmem:[#allocation2 + $0x13c] sm:$0xff] }
  0x68   : > { %v827_v12 = vadd.f32 0.5, %v795_v62  ;;  %v764_v45 = vsub.f32 %v1109_v15, %v732_v4  ;;  %v733_v38 = vmul.f32 0.04, %v701_v14  ;;  %v495_v6 = vadd.f32 %v455_v41, %v415_v11  ;;  %v456_v15 = vld [vmem:[#allocation2 + $0x13b] sm:$0xff]  ;;  %v537_v41 = vld [vmem:[#allocation2 + $0x144] sm:$0xff] }
  0x69   : > { %v1355_v42 = vadd.f32 %v534_v5, %v494_v40  ;;  %v671_v10 = vadd.f32 %v639_v55, %v1344_v7  ;;  %v416_v54 = vadd.f32 %v376_v52, %v336_v36  ;;  %v608_v39 = vadd.f32 %v1310_v34, %v1295_v35  ;;  %v258_v35 = vld [vmem:[#allocation2 + $0x150] sm:$0xff]  ;;  %v259_v62 = vld [vmem:[#allocation2 + $0x158] sm:$0xff] }
  0x6a   : > { %859 = vst.msk [vmem:[%s1224_s15 + $0x68] sm:$0xff] %vm149_vm0, %v827_v12  ;;  %v796_v8 = vmul.f32 0.5, %v764_v45  ;;  %v765_v31 = vsub.f32 %v1118_v16, %v733_v38  ;;  %v1363_v58 = vadd.f32 %v535_v53, %v495_v6  ;;  %v337_v2 = vadd.f32 %v297_v9, %v257_v51  ;;  %v299_v4 = vld [vmem:[#allocation2 + $0x159] sm:$0xff] }
  0x6b   : > { %v702_v63 = vadd.f32 %v670_v50, %v1355_v42  ;;  %v496_v59 = vadd.f32 %v456_v15, %v416_v54  ;;  %v640_v13 = vadd.f32 %v608_v39, %v1333_v43  ;;  %v609_v3 = vadd.f32 %v1324_v1, %v1303_v48  ;;  %v378_v36 = vld [vmem:[#allocation2 + $0x152] sm:$0xff]  ;;  %v379_v53 = vld [vmem:[#allocation2 + $0x15a] sm:$0xff]  ;;  %v300_v15 = vld [vmem:[#allocation2 + $0x169] sm:$0xff] }
  0x6c   : > { %v828_v60 = vadd.f32 0.5, %v796_v8  ;;  %v797_v49 = vmul.f32 0.5, %v765_v31  ;;  %v703_v16 = vadd.f32 %v671_v10, %v1363_v58  ;;  %v417_v0 = vadd.f32 %v377_v44, %v337_v2  ;;  %v538_v8 = vld [vmem:[#allocation2 + $0x154] sm:$0xff]  ;;  %v260_v31 = vld [vmem:[#allocation2 + $0x168] sm:$0xff] }
  0x6d   : > { %v734_v56 = vmul.f32 0.04, %v702_v63  ;;  %v1370_v33 = vadd.f32 %v536_v57, %v496_v59  ;;  %v672_v61 = vadd.f32 %v640_v13, %v1355_v42  ;;  %v641_v32 = vadd.f32 %v609_v3, %v1344_v7  ;;  %v459_v13 = vld [vmem:[#allocation2 + $0x15b] sm:$0xff]  ;;  %v261_v3 = vld [vmem:[#allocation2 + $0x170] sm:$0xff] }
  0x6e   : > { %860 = vst.msk [vmem:[%s1224_s15 + $0x70] sm:$0xff] %vm149_vm0, %v828_v60  ;;  %v829_v48 = vadd.f32 0.5, %v797_v49  ;;  %v735_v14 = vmul.f32 0.04, %v703_v16  ;;  %v497_v37 = vadd.f32 %v457_v47, %v417_v0  ;;  %v338_v11 = vadd.f32 %v298_v46, %v258_v35  ;;  %v539_v57 = vld [vmem:[#allocation2 + $0x15c] sm:$0xff] }
  0x6f   : > { %v766_v40 = vsub.f32 %v1121_v17, %v734_v56  ;;  %v704_v50 = vadd.f32 %v672_v61, %v1370_v33  ;;  %v673_v55 = vadd.f32 %v641_v32, %v1363_v58  ;;  %v610_v51 = vadd.f32 %v1333_v43, %v1310_v34  ;;  %v458_v17 = vld [vmem:[#allocation2 + $0x153] sm:$0xff] }
  0x70   : > { %861 = vst.msk [vmem:[%s1224_s15 + $0x78] sm:$0xff] %vm149_vm0, %v829_v48  ;;  %v767_v9 = vsub.f32 %v1124_v18, %v735_v14  ;;  %v1384_v12 = vadd.f32 %v537_v41, %v497_v37  ;;  %v418_v45 = vadd.f32 %v378_v36, %v338_v11  ;;  %v339_v38 = vadd.f32 %v299_v4, %v259_v62  ;;  %v380_v62 = vld [vmem:[#allocation2 + $0x16a] sm:$0xff]  ;;  %v262_v48 = vld [vmem:[#allocation2 + $0x180] sm:$0xff] }
  0x71   : > { %v798_v5 = vmul.f32 0.5, %v766_v40  ;;  %v736_v6 = vmul.f32 0.04, %v704_v50  ;;  %v642_v52 = vadd.f32 %v610_v51, %v1355_v42  ;;  %v611_v10 = vadd.f32 %v1344_v7, %v1324_v1  ;;  %v301_v1 = vld [vmem:[#allocation2 + $0x171] sm:$0xff]  ;;  %v302_v14 = vld [vmem:[#allocation2 + $0x181] sm:$0xff] }
  0x72   : > { %v799_v54 = vmul.f32 0.5, %v767_v9  ;;  %v705_v34 = vadd.f32 %v673_v55, %v1384_v12  ;;  %v498_v39 = vadd.f32 %v458_v17, %v418_v45  ;;  %v419_v18 = vadd.f32 %v379_v53, %v339_v38  ;;  %v381_v50 = vld [vmem:[#allocation2 + $0x172] sm:$0xff]  ;;  %v263_v17 = vld [vmem:[#allocation2 + $0x188] sm:$0xff] }
  0x73   : > { %v830_v2 = vadd.f32 0.5, %v798_v5  ;;  %v768_v63 = vsub.f32 %v1133_v19, %v736_v6  ;;  %v674_v59 = vadd.f32 %v642_v52, %v1370_v33  ;;  %v643_v44 = vadd.f32 %v611_v10, %v1363_v58  ;;  %v460_v36 = vld [vmem:[#allocation2 + $0x16b] sm:$0xff]  ;;  %v461_v38 = vld [vmem:[#allocation2 + $0x173] sm:$0xff] }
  0x74   : > { %v831_v35 = vadd.f32 0.5, %v799_v54  ;;  %v737_v46 = vmul.f32 0.04, %v705_v34  ;;  %v1393_v60 = vadd.f32 %v538_v8, %v498_v39  ;;  %v499_v49 = vadd.f32 %v459_v13, %v419_v18  ;;  %v303_v52 = vld [vmem:[#allocation2 + $0x189] sm:$0xff]  ;;  %v541_v18 = vld [vmem:[#allocation2 + $0x174] sm:$0xff] }
  0x75   : > { %862 = vst.msk [vmem:[%s1224_s15 + $0x80] sm:$0xff] %vm149_vm0, %v830_v2  ;;  %v800_v16 = vmul.f32 0.5, %v768_v63  ;;  %v675_v0 = vadd.f32 %v643_v44, %v1384_v12  ;;  %v340_v19 = vadd.f32 %v300_v15, %v260_v31  ;;  %v612_v56 = vadd.f32 %v1355_v42, %v1333_v43  ;;  %v540_v54 = vld [vmem:[#allocation2 + $0x16c] sm:$0xff]  ;;  %v382_v39 = vld [vmem:[#allocation2 + $0x182] sm:$0xff] }
  0x76   : > { %863 = vst.msk [vmem:[%s1224_s15 + $0x88] sm:$0xff] %vm149_vm0, %v831_v35  ;;  %v769_v61 = vsub.f32 %v1136_v20, %v737_v46  ;;  %v706_v47 = vadd.f32 %v674_v59, %v1393_v60  ;;  %v1404_v32 = vadd.f32 %v539_v57, %v499_v49  ;;  %v341_v4 = vadd.f32 %v301_v1, %v261_v3  ;;  %v383_v46 = vld [vmem:[#allocation2 + $0x18a] sm:$0xff] }
  0x77   : > { %v832_v37 = vadd.f32 0.5, %v800_v16  ;;  %v420_v11 = vadd.f32 %v380_v62, %v340_v19  ;;  %v644_v40 = vadd.f32 %v612_v56, %v1370_v33  ;;  %v613_v43 = vadd.f32 %v1363_v58, %v1344_v7  ;;  %v304_v16 = vld [vmem:[#allocation2 + $0x199] sm:$0xff]  ;;  %v542_v19 = vld [vmem:[#allocation2 + $0x184] sm:$0xff] }
  0x78   : > { %v801_v41 = vmul.f32 0.5, %v769_v61  ;;  %v738_v55 = vmul.f32 0.04, %v706_v47  ;;  %v707_v20 = vadd.f32 %v675_v0, %v1404_v32  ;;  %v421_v51 = vadd.f32 %v381_v50, %v341_v4  ;;  %v463_v61 = vld [vmem:[#allocation2 + $0x18b] sm:$0xff] }
  0x79   : > { %864 = vst.msk [vmem:[%s1224_s15 + $0x90] sm:$0xff] %vm149_vm0, %v832_v37  ;;  %v500_v9 = vadd.f32 %v460_v36, %v420_v11  ;;  %v676_v45 = vadd.f32 %v644_v40, %v1393_v60  ;;  %v645_v5 = vadd.f32 %v613_v43, %v1384_v12  ;;  %v342_v6 = vadd.f32 %v302_v14, %v262_v48  ;;  %v384_v14 = vld [vmem:[#allocation2 + $0x19a] sm:$0xff] }
  0x7a   : > { %v833_v53 = vadd.f32 0.5, %v801_v41  ;;  %v770_v7 = vsub.f32 %v1139_v21, %v738_v55  ;;  %v739_v10 = vmul.f32 0.04, %v707_v20  ;;  %v501_v34 = vadd.f32 %v461_v38, %v421_v51  ;;  %v462_v21 = vld [vmem:[#allocation2 + $0x183] sm:$0xff]  ;;  %v543_v20 = vld [vmem:[#allocation2 + $0x18c] sm:$0xff] }
  0x7b   : > { %v1415_v8 = vadd.f32 %v540_v54, %v500_v9  ;;  %v677_v31 = vadd.f32 %v645_v5, %v1404_v32  ;;  %v422_v15 = vadd.f32 %v382_v39, %v342_v6  ;;  %v614_v2 = vadd.f32 %v1370_v33, %v1355_v42  ;;  %v264_v42 = vld [vmem:[#allocation2 + $0x198] sm:$0xff]  ;;  %v305_v37 = vld [vmem:[#allocation2 + $0x1a1] sm:$0xff] }
  0x7c   : > { %865 = vst.msk [vmem:[%s1224_s15 + $0x98] sm:$0xff] %vm149_vm0, %v833_v53  ;;  %v802_v63 = vmul.f32 0.5, %v770_v7  ;;  %v771_v59 = vsub.f32 %v1148_v22, %v739_v10  ;;  %v1423_v13 = vadd.f32 %v541_v18, %v501_v34  ;;  %v343_v44 = vadd.f32 %v303_v52, %v263_v17  ;;  %v385_v9 = vld [vmem:[#allocation2 + $0x1a2] sm:$0xff]  ;;  %v306_v18 = vld [vmem:[#allocation2 + $0x1b1] sm:$0xff] }
  0x7d   : > { %v708_v3 = vadd.f32 %v676_v45, %v1415_v8  ;;  %v502_v1 = vadd.f32 %v462_v21, %v422_v15  ;;  %v646_v35 = vadd.f32 %v614_v2, %v1393_v60  ;;  %v615_v49 = vadd.f32 %v1384_v12, %v1363_v58  ;;  %v265_v58 = vld [vmem:[#allocation2 + $0x1a0] sm:$0xff]  ;;  %v267_v21 = vld [vmem:[#allocation2 + $0x1b8] sm:$0xff] }
  0x7e   : > { %v834_v57 = vadd.f32 0.5, %v802_v63  ;;  %v803_v0 = vmul.f32 0.5, %v771_v59  ;;  %v709_v22 = vadd.f32 %v677_v31, %v1423_v13  ;;  %v423_v56 = vadd.f32 %v383_v46, %v343_v44  ;;  %v544_v34 = vld [vmem:[#allocation2 + $0x19c] sm:$0xff]  ;;  %v386_v46 = vld [vmem:[#allocation2 + $0x1b2] sm:$0xff] }
  0x7f   : > { %v740_v47 = vmul.f32 0.04, %v708_v3  ;;  %v1430_v62 = vadd.f32 %v542_v19, %v502_v1  ;;  %v678_v4 = vadd.f32 %v646_v35, %v1415_v8  ;;  %v647_v48 = vadd.f32 %v615_v49, %v1404_v32  ;;  %v465_v63 = vld [vmem:[#allocation2 + $0x1a3] sm:$0xff] }
  0x80   : > { %866 = vst.msk [vmem:[%s1224_s15 + $0xa0] sm:$0xff] %vm149_vm0, %v834_v57  ;;  %v835_v11 = vadd.f32 0.5, %v803_v0  ;;  %v741_v40 = vmul.f32 0.04, %v709_v22  ;;  %v503_v50 = vadd.f32 %v463_v61, %v423_v56  ;;  %v344_v43 = vadd.f32 %v304_v16, %v264_v42  ;;  %v545_v42 = vld [vmem:[#allocation2 + $0x1a4] sm:$0xff]  ;;  %v387_v0 = vld [vmem:[#allocation2 + $0x1ba] sm:$0xff] }
  0x81   : > { %v772_v41 = vsub.f32 %v1151_v23, %v740_v47  ;;  %v710_v55 = vadd.f32 %v678_v4, %v1430_v62  ;;  %v679_v36 = vadd.f32 %v647_v48, %v1423_v13  ;;  %v616_v51 = vadd.f32 %v1393_v60, %v1370_v33  ;;  %v464_v23 = vld [vmem:[#allocation2 + $0x19b] sm:$0xff]  ;;  %v466_v61 = vld [vmem:[#allocation2 + $0x1b3] sm:$0xff]  ;;  %v268_v4 = vld [vmem:[#allocation2 + $0x1c8] sm:$0xff] }
  0x82   : > { %867 = vst.msk [vmem:[%s1224_s15 + $0xa8] sm:$0xff] %vm149_vm0, %v835_v11  ;;  %v773_v45 = vsub.f32 %v1154_v24, %v741_v40  ;;  %v1444_v38 = vadd.f32 %v543_v20, %v503_v50  ;;  %v424_v5 = vadd.f32 %v384_v14, %v344_v43  ;;  %v345_v6 = vadd.f32 %v305_v37, %v265_v58  ;;  %v266_v24 = vld [vmem:[#allocation2 + $0x1b0] sm:$0xff]  ;;  %v467_v11 = vld [vmem:[#allocation2 + $0x1bb] sm:$0xff] }
  0x83   : > { %v804_v17 = vmul.f32 0.5, %v772_v41  ;;  %v742_v52 = vmul.f32 0.04, %v710_v55  ;;  %v648_v53 = vadd.f32 %v616_v51, %v1415_v8  ;;  %v617_v7 = vadd.f32 %v1404_v32, %v1384_v12  ;;  %v307_v12 = vld [vmem:[#allocation2 + $0x1b9] sm:$0xff]  ;;  %v308_v48 = vld [vmem:[#allocation2 + $0x1c9] sm:$0xff] }
  0x84   : > { %v805_v10 = vmul.f32 0.5, %v773_v45  ;;  %v711_v33 = vadd.f32 %v679_v36, %v1444_v38  ;;  %v504_v54 = vadd.f32 %v464_v23, %v424_v5  ;;  %v425_v39 = vadd.f32 %v385_v9, %v345_v6  ;;  %v546_v41 = vld [vmem:[#allocation2 + $0x1b4] sm:$0xff]  ;;  %v388_v55 = vld [vmem:[#allocation2 + $0x1ca] sm:$0xff]  ;;  %v547_v51 = vld [vmem:[#allocation2 + $0x1bc] sm:$0xff] }
  0x85   : > { %v836_v31 = vadd.f32 0.5, %v804_v17  ;;  %v774_v15 = vsub.f32 %v1163_v25, %v742_v52  ;;  %v680_v2 = vadd.f32 %v648_v53, %v1430_v62  ;;  %v649_v59 = vadd.f32 %v617_v7, %v1423_v13  ;;  %v269_v5 = vld [vmem:[#allocation2 + $0x1d0] sm:$0xff] }
  0x86   : > { %v837_v44 = vadd.f32 0.5, %v805_v10  ;;  %v743_v3 = vmul.f32 0.04, %v711_v33  ;;  %v584_v1 = vadd.f32 %v544_v34, %v504_v54  ;;  %v505_v35 = vadd.f32 %v465_v63, %v425_v39  ;;  %v309_v6 = vld [vmem:[#allocation2 + $0x1d1] sm:$0xff] }
  0x87   : > { %868 = vst.msk [vmem:[%s1224_s15 + $0xb0] sm:$0xff] %vm149_vm0, %v836_v31  ;;  %v806_v49 = vmul.f32 0.5, %v774_v15  ;;  %v681_v16 = vadd.f32 %v649_v59, %v1444_v38  ;;  %v346_v25 = vadd.f32 %v306_v18, %v266_v24  ;;  %v618_v57 = vadd.f32 %v1415_v8, %v1393_v60  ;;  %v468_v53 = vld [vmem:[#allocation2 + $0x1cb] sm:$0xff]  ;;  %v469_v59 = vld [vmem:[#allocation2 + $0x1d3] sm:$0xff] }
  0x88   : > { %869 = vst.msk [vmem:[%s1224_s15 + $0xb8] sm:$0xff] %vm149_vm0, %v837_v44  ;;  %v775_v22 = vsub.f32 %v1166_v26, %v743_v3  ;;  %v712_v19 = vadd.f32 %v680_v2, %v584_v1  ;;  %v585_v56 = vadd.f32 %v545_v42, %v505_v35  ;;  %v347_v47 = vadd.f32 %v307_v12, %v267_v21  ;;  %v389_v34 = vld [vmem:[#allocation2 + $0x1d2] sm:$0xff] }
  0x89   : > { %v838_v14 = vadd.f32 0.5, %v806_v49  ;;  %v426_v58 = vadd.f32 %v386_v46, %v346_v25  ;;  %v650_v37 = vadd.f32 %v618_v57, %v1430_v62  ;;  %v619_v60 = vadd.f32 %v1423_v13, %v1404_v32  ;;  %v548_v31 = vld [vmem:[#allocation2 + $0x1cc] sm:$0xff] }
  0x8a   : > { %v807_v40 = vmul.f32 0.5, %v775_v22  ;;  %v744_v50 = vmul.f32 0.04, %v712_v19  ;;  %v713_v43 = vadd.f32 %v681_v16, %v585_v56  ;;  %v427_v26 = vadd.f32 %v387_v0, %v347_v47 }
  0x8b   : > { %870 = vst.msk [vmem:[%s1224_s15 + $0xc0] sm:$0xff] %vm149_vm0, %v838_v14  ;;  %v506_v20 = vadd.f32 %v466_v61, %v426_v58  ;;  %v682_v36 = vadd.f32 %v650_v37, %v584_v1  ;;  %v651_v9 = vadd.f32 %v619_v60, %v1444_v38  ;;  %v348_v45 = vadd.f32 %v308_v48, %v268_v4  ;;  %v1501_v4 = vld [vmem:[#allocation3_spill] sm:$0xff]  ;;  %v1502_v37 = vld [vmem:[#allocation4_spill] sm:$0xff] }
  0x8c   : > { %v839_v17 = vadd.f32 0.5, %v807_v40  ;;  %v776_v32 = vsub.f32 %v1169_v27, %v744_v50  ;;  %v745_v52 = vmul.f32 0.04, %v713_v43  ;;  %v507_v23 = vadd.f32 %v467_v11, %v427_v26 }
  0x8d   : > { %v586_v7 = vadd.f32 %v546_v41, %v506_v20  ;;  %v683_v10 = vadd.f32 %v651_v9, %v585_v56  ;;  %v428_v33 = vadd.f32 %v388_v55, %v348_v45  ;;  %v620_v54 = vadd.f32 %v1430_v62, %v1415_v8 }
  0x8e   : > { %871 = vst.msk [vmem:[%s1224_s15 + $0xc8] sm:$0xff] %vm149_vm0, %v839_v17  ;;  %v808_v39 = vmul.f32 0.5, %v776_v32  ;;  %v777_v24 = vsub.f32 %v1178_v28, %v745_v52  ;;  %v587_v18 = vadd.f32 %v547_v51, %v507_v23  ;;  %v349_v15 = vadd.f32 %v309_v6, %v269_v5  ;;  %v549_v28 = vld [vmem:[#allocation2 + $0x1d4] sm:$0xff] }
  0x8f   : > { %v714_v27 = vadd.f32 %v682_v36, %v586_v7  ;;  %v508_v2 = vadd.f32 %v468_v53, %v428_v33  ;;  %v652_v63 = vadd.f32 %v620_v54, %v584_v1  ;;  %v621_v21 = vadd.f32 %v1444_v38, %v1423_v13 }
  0x90   : > { %v840_v12 = vadd.f32 0.5, %v808_v39  ;;  %v809_v8 = vmul.f32 0.5, %v777_v24  ;;  %v715_v62 = vadd.f32 %v683_v10, %v587_v18  ;;  %v429_v44 = vadd.f32 %v389_v34, %v349_v15 }
  0x91   : > { %v746_v3 = vmul.f32 0.04, %v714_v27  ;;  %v588_v35 = vadd.f32 %v548_v31, %v508_v2  ;;  %v684_v46 = vadd.f32 %v652_v63, %v586_v7  ;;  %v653_v49 = vadd.f32 %v621_v21, %v585_v56 }
  0x92   : > { %872 = vst.msk [vmem:[%s1224_s15 + $0xd0] sm:$0xff] %vm149_vm0, %v840_v12  ;;  %v841_v42 = vadd.f32 0.5, %v809_v8  ;;  %v747_v16 = vmul.f32 0.04, %v715_v62  ;;  %v509_v1 = vadd.f32 %v469_v59, %v429_v44 }
  0x93   : > { %v778_v25 = vsub.f32 %v1181_v29, %v746_v3  ;;  %v716_v13 = vadd.f32 %v684_v46, %v588_v35  ;;  %v685_v38 = vadd.f32 %v653_v49, %v587_v18 }
  0x94   : > { %873 = vst.msk [vmem:[%s1224_s15 + $0xd8] sm:$0xff] %vm149_vm0, %v841_v42  ;;  %v779_v57 = vsub.f32 %v1184_v30, %v747_v16  ;;  %v589_v0 = vadd.f32 %v549_v28, %v509_v1 }
  0x95   : > { %v810_v22 = vmul.f32 0.5, %v778_v25  ;;  %v748_v19 = vmul.f32 0.04, %v716_v13 }
  0x96   : > { %v811_v56 = vmul.f32 0.5, %v779_v57  ;;  %v717_v61 = vadd.f32 %v685_v38, %v589_v0 }
  0x97   : > { %v842_v47 = vadd.f32 0.5, %v810_v22  ;;  %v780_v48 = vsub.f32 %v1501_v4, %v748_v19 }
  0x98   : > { %v843_v14 = vadd.f32 0.5, %v811_v56  ;;  %v749_v58 = vmul.f32 0.04, %v717_v61 }
  0x99   : > { %874 = vst.msk [vmem:[%s1224_s15 + $0xe0] sm:$0xff] %vm149_vm0, %v842_v47  ;;  %v812_v29 = vmul.f32 0.5, %v780_v48 }
  0x9a   : > { %875 = vst.msk [vmem:[%s1224_s15 + $0xe8] sm:$0xff] %vm149_vm0, %v843_v14  ;;  %v781_v11 = vsub.f32 %v1502_v37, %v749_v58 }
  0x9b   : > { %v844_v30 = vadd.f32 0.5, %v812_v29 }
  0x9c   : > { %v813_v60 = vmul.f32 0.5, %v781_v11 }
  0x9d   : > { %876 = vst.msk [vmem:[%s1224_s15 + $0xf0] sm:$0xff] %vm149_vm0, %v844_v30 }
  0x9e   : > { %v845_v40 = vadd.f32 0.5, %v813_v60 }
  0xa0   : > { %877 = vst.msk [vmem:[%s1224_s15 + $0xf8] sm:$0xff] %vm149_vm0, %v845_v40 }
  0xa1 PF: > { %s11_s6 = sadd.s32 1, %s961_s6  }
  0xa2   : > { %p8_p4 = scmp.ge.s32.totalorder %s11_s6, 4  }
  0xa4   :  { %10 = sbr.rel (!%p8_p4) target bundleno = 1 (0x1), region = 56 }

</bundles_post_ra>
